<compile_context>
chip_gen: v7x
topology: tpu7x:2x2x1
jax: 0.10.0
libtpu: 0.0.40
codegen_flags: <defaults>
</compile_context>

<pallas_src>
import functools

import jax
import jax.numpy as jnp
from jax.experimental import pallas as pl
from jax.experimental.pallas import tpu as pltpu


def _fused_mlp_kernel(*refs):
    """Fused multi-layer Linear + bias + ReLU.

    refs = (x_ref, w0_ref, b0_ref, ..., w{L-1}_ref, b{L-1}_ref, o_ref)
      x_ref : (TB, Din)        bf16 activation tile
      wi    : (Din_i, Dout_i)  bf16, pre-transposed (in, out)
      bi    : (1, Dout_i)      f32
      o_ref : (TB, Dout_last)  f32
    """
    x_ref, o_ref = refs[0], refs[-1]
    wb_refs = refs[1:-1]
    num_layers = len(wb_refs) // 2

    h = x_ref[...]                                       # (TB, Din) bf16
    for i in range(num_layers):                          # statically unrolled
        w_ref = wb_refs[2 * i]
        b_ref = wb_refs[2 * i + 1]
        # bf16 MXU matmul with f32 accumulation; intermediates stay in VMEM.
        y = jnp.dot(h, w_ref[...], preferred_element_type=jnp.float32)
        h_f32 = jnp.maximum(y + b_ref[...], 0.0)         # bias + ReLU in f32
        # Keep inter-layer activations bf16 (halves vreg/VMEM footprint);
        # last layer stays f32 straight into the f32 output.
        h = h_f32.astype(jnp.bfloat16) if i < num_layers - 1 else h_f32
    o_ref[...] = h.astype(o_ref.dtype)


def _pick_batch_tile(batch):
    """Whole-batch block when small (grid=(1,), no per-step overhead on 1-TC
    chips); otherwise a fixed large tile with a cdiv grid (ragged last block OK)."""
    if batch <= 512:
        return batch
    return 512


@functools.partial(jax.jit, static_argnames=("batch_tile",))
def dnn_forward(x, params, batch_tile=None):
    """Forward pass of DNN as a single fused Pallas kernel.

    x      : (B, inputs_dim) f32 (cast to bf16 at the kernel boundary)
    params : tuple of (w_t, b) with w_t (Din_i, Dout_i) bf16, b (1, Dout_i) f32
    """
    batch, din = x.shape
    dout = params[-1][0].shape[1]
    tb = batch_tile if batch_tile is not None else _pick_batch_tile(batch)
    grid = (pl.cdiv(batch, tb),)

    # Halve the activation DMA: the kernel cast to bf16 before the first dot
    # anyway, so this is bit-identical for the matmul.
    x_bf16 = x.astype(jnp.bfloat16)

    in_specs = [pl.BlockSpec((tb, din), lambda i: (i, 0))]
    flat_params = []
    flops = 0
    bytes_accessed = x_bf16.size * 2 + batch * dout * 4
    for w_t, b in params:
        # Weights/biases: full-array blocks, constant index_map -> fetched once,
        # resident in VMEM across all batch tiles.
        in_specs.append(pl.BlockSpec(w_t.shape, lambda i: (0, 0)))
        in_specs.append(pl.BlockSpec(b.shape, lambda i: (0, 0)))
        flat_params.extend([w_t, b])
        flops += 2 * batch * w_t.shape[0] * w_t.shape[1]
        bytes_accessed += w_t.size * 2 + b.size * 4

    out_spec = pl.BlockSpec((tb, dout), lambda i: (i, 0))

    return pl.pallas_call(
        _fused_mlp_kernel,
        out_shape=jax.ShapeDtypeStruct((batch, dout), jnp.float32),
        grid=grid,
        in_specs=in_specs,
        out_specs=out_spec,
        compiler_params=pltpu.CompilerParams(
            dimension_semantics=("parallel",),
            vmem_limit_bytes=32 * 1024 * 1024),
        cost_estimate=pl.CostEstimate(
            flops=int(flops),
            transcendentals=0,
            bytes_accessed=int(bytes_accessed)),
    )(x_bf16, *flat_params)


def init_dnn_params(key, inputs_dim, hidden_units, init_std=1e-4):
    """Parameter init mirroring the PyTorch module:
       weights ~ Normal(0, init_std) (stored transposed, bf16);
       biases keep nn.Linear default Uniform(-1/sqrt(fan_in), 1/sqrt(fan_in)) (f32).
       NOTE: weights are held/multiplied in bf16 (MXU-native); parity with the
       exact f32 PyTorch DNN is therefore ~1e-2 relative, by design."""
    dims = [inputs_dim] + list(hidden_units)
    params = []
    for i in range(len(dims) - 1):
        key, kw, kb = jax.random.split(key, 3)
        fan_in, fan_out = dims[i], dims[i + 1]
        w_t = (init_std * jax.random.normal(kw, (fan_in, fan_out),
                                            dtype=jnp.float32)).astype(jnp.bfloat16)
        bound = 1.0 / (fan_in ** 0.5)
        b = jax.random.uniform(kb, (1, fan_out), minval=-bound, maxval=bound,
                               dtype=jnp.float32)
        params.append((w_t, b))
    return tuple(params)


def dnn_forward_ref(x, params):
    """Pure-JAX reference using the identical precision recipe
    (bf16 activations/weights, f32 accumulation, f32 bias+ReLU)."""
    h = x.astype(jnp.bfloat16)
    h_f32 = None
    for i, (w_t, b) in enumerate(params):
        y = jnp.dot(h, w_t, preferred_element_type=jnp.float32)
        h_f32 = jnp.maximum(y + b, 0.0)
        h = h_f32.astype(jnp.bfloat16)
    return h_f32


if __name__ == "__main__":
    key = jax.random.PRNGKey(0)
    batch = 256
    inputs_dim = 32
    hidden_units = (64, 32, 16)

    key, kx, kp = jax.random.split(key, 3)
    x = jax.random.normal(kx, (batch, inputs_dim), dtype=jnp.float32)
    params = init_dnn_params(kp, inputs_dim, hidden_units)

    out = dnn_forward(x, params)
    out = jax.block_until_ready(out)

    ref = dnn_forward_ref(x, params)
    assert out.shape == (batch, hidden_units[-1])
    assert jnp.allclose(out, ref, atol=1e-4, rtol=1e-3), (
        float(jnp.max(jnp.abs(out - ref))))

    print("KERNEL_OK")
</pallas_src>

<mosaic_0001>
module attributes {stable_mosaic.version = 11 : i64} {
  func.func @_fused_mlp_kernel(%arg0: i32, %arg1: memref<256x32xbf16, #tpu.memory_space<vmem>>, %arg2: memref<32x64xbf16, #tpu.memory_space<vmem>>, %arg3: memref<1x64xf32, #tpu.memory_space<vmem>>, %arg4: memref<64x32xbf16, #tpu.memory_space<vmem>>, %arg5: memref<1x32xf32, #tpu.memory_space<vmem>>, %arg6: memref<32x16xbf16, #tpu.memory_space<vmem>>, %arg7: memref<1x16xf32, #tpu.memory_space<vmem>>, %arg8: memref<256x16xf32, #tpu.memory_space<vmem>>) attributes {dimension_semantics = [#tpu.dimension_semantics<parallel>], iteration_bounds = array<i64: 1>, scalar_prefetch = 0 : i64, scratch_operands = 0 : i64, tpu.core_type = #tpu.core_type<tc>, window_params = [{transform_indices = @transform_0, window_bounds = array<i64: 256, 32>}, {pipeline_mode = #tpu.pipeline_mode<synchronous>, transform_indices = @transform_1, window_bounds = array<i64: 32, 64>}, {pipeline_mode = #tpu.pipeline_mode<synchronous>, transform_indices = @transform_2, window_bounds = array<i64: 1, 64>}, {pipeline_mode = #tpu.pipeline_mode<synchronous>, transform_indices = @transform_3, window_bounds = array<i64: 64, 32>}, {pipeline_mode = #tpu.pipeline_mode<synchronous>, transform_indices = @transform_4, window_bounds = array<i64: 1, 32>}, {pipeline_mode = #tpu.pipeline_mode<synchronous>, transform_indices = @transform_5, window_bounds = array<i64: 32, 16>}, {pipeline_mode = #tpu.pipeline_mode<synchronous>, transform_indices = @transform_6, window_bounds = array<i64: 1, 16>}, {transform_indices = @transform_7, window_bounds = array<i64: 256, 16>}]} {
    %c0 = arith.constant 0 : index
    %c0_0 = arith.constant 0 : index
    %0 = vector.load %arg1[%c0, %c0_0] : memref<256x32xbf16, #tpu.memory_space<vmem>>, vector<256x32xbf16>
    %c0_1 = arith.constant 0 : index
    %c0_2 = arith.constant 0 : index
    %1 = vector.load %arg2[%c0_1, %c0_2] : memref<32x64xbf16, #tpu.memory_space<vmem>>, vector<32x64xbf16>
    %cst = arith.constant dense<0.000000e+00> : vector<256x64xf32>
    %2 = tpu.matmul %0, %1, %cst {dimension_numbers = #tpu.dot_dimension_numbers<[1], [0], [0], [1], [0, 0, 1, 1], [], []>} : vector<256x32xbf16>, vector<32x64xbf16>, vector<256x64xf32> -> vector<256x64xf32>
    %c0_3 = arith.constant 0 : index
    %c0_4 = arith.constant 0 : index
    %3 = vector.load %arg3[%c0_3, %c0_4] : memref<1x64xf32, #tpu.memory_space<vmem>>, vector<1x64xf32>
    %4 = vector.broadcast %3 : vector<1x64xf32> to vector<256x64xf32>
    %5 = arith.addf %2, %4 : vector<256x64xf32>
    %cst_5 = arith.constant 0.000000e+00 : f32
    %6 = vector.broadcast %cst_5 : f32 to vector<256x64xf32>
    %7 = arith.maximumf %5, %6 : vector<256x64xf32>
    %8 = arith.truncf %7 : vector<256x64xf32> to vector<256x64xbf16>
    %c0_6 = arith.constant 0 : index
    %c0_7 = arith.constant 0 : index
    %9 = vector.load %arg4[%c0_6, %c0_7] : memref<64x32xbf16, #tpu.memory_space<vmem>>, vector<64x32xbf16>
    %cst_8 = arith.constant dense<0.000000e+00> : vector<256x32xf32>
    %10 = tpu.matmul %8, %9, %cst_8 {dimension_numbers = #tpu.dot_dimension_numbers<[1], [0], [0], [1], [0, 0, 1, 1], [], []>} : vector<256x64xbf16>, vector<64x32xbf16>, vector<256x32xf32> -> vector<256x32xf32>
    %c0_9 = arith.constant 0 : index
    %c0_10 = arith.constant 0 : index
    %11 = vector.load %arg5[%c0_9, %c0_10] : memref<1x32xf32, #tpu.memory_space<vmem>>, vector<1x32xf32>
    %12 = vector.broadcast %11 : vector<1x32xf32> to vector<256x32xf32>
    %13 = arith.addf %10, %12 : vector<256x32xf32>
    %cst_11 = arith.constant 0.000000e+00 : f32
    %14 = vector.broadcast %cst_11 : f32 to vector<256x32xf32>
    %15 = arith.maximumf %13, %14 : vector<256x32xf32>
    %16 = arith.truncf %15 : vector<256x32xf32> to vector<256x32xbf16>
    %c0_12 = arith.constant 0 : index
    %c0_13 = arith.constant 0 : index
    %17 = vector.load %arg6[%c0_12, %c0_13] : memref<32x16xbf16, #tpu.memory_space<vmem>>, vector<32x16xbf16>
    %cst_14 = arith.constant dense<0.000000e+00> : vector<256x16xf32>
    %18 = tpu.matmul %16, %17, %cst_14 {dimension_numbers = #tpu.dot_dimension_numbers<[1], [0], [0], [1], [0, 0, 1, 1], [], []>} : vector<256x32xbf16>, vector<32x16xbf16>, vector<256x16xf32> -> vector<256x16xf32>
    %c0_15 = arith.constant 0 : index
    %c0_16 = arith.constant 0 : index
    %19 = vector.load %arg7[%c0_15, %c0_16] : memref<1x16xf32, #tpu.memory_space<vmem>>, vector<1x16xf32>
    %20 = vector.broadcast %19 : vector<1x16xf32> to vector<256x16xf32>
    %21 = arith.addf %18, %20 : vector<256x16xf32>
    %cst_17 = arith.constant 0.000000e+00 : f32
    %22 = vector.broadcast %cst_17 : f32 to vector<256x16xf32>
    %23 = arith.maximumf %21, %22 : vector<256x16xf32>
    %c0_18 = arith.constant 0 : index
    %c0_19 = arith.constant 0 : index
    %24 = vector.load %arg8[%c0_18, %c0_19] : memref<256x16xf32, #tpu.memory_space<vmem>>, vector<256x16xf32>
    tpu.vector_store %arg8[%c0_18, %c0_19], %23 {strides = array<i32>} : memref<256x16xf32, #tpu.memory_space<vmem>>, vector<256x16xf32>,
    return
  }
  func.func @transform_0(%arg0: i32) -> (i32, i32) {
    %c0_i32 = arith.constant 0 : i32
    %c0_i32_0 = arith.constant 0 : i32
    return %arg0, %c0_i32 : i32, i32
  }
  func.func @transform_1(%arg0: i32) -> (i32, i32) {
    %c0_i32 = arith.constant 0 : i32
    %c0_i32_0 = arith.constant 0 : i32
    %c0_i32_1 = arith.constant 0 : i32
    return %c0_i32, %c0_i32_0 : i32, i32
  }
  func.func @transform_2(%arg0: i32) -> (i32, i32) {
    %c0_i32 = arith.constant 0 : i32
    %c0_i32_0 = arith.constant 0 : i32
    %c0_i32_1 = arith.constant 0 : i32
    return %c0_i32, %c0_i32_0 : i32, i32
  }
  func.func @transform_3(%arg0: i32) -> (i32, i32) {
    %c0_i32 = arith.constant 0 : i32
    %c0_i32_0 = arith.constant 0 : i32
    %c0_i32_1 = arith.constant 0 : i32
    return %c0_i32, %c0_i32_0 : i32, i32
  }
  func.func @transform_4(%arg0: i32) -> (i32, i32) {
    %c0_i32 = arith.constant 0 : i32
    %c0_i32_0 = arith.constant 0 : i32
    %c0_i32_1 = arith.constant 0 : i32
    return %c0_i32, %c0_i32_0 : i32, i32
  }
  func.func @transform_5(%arg0: i32) -> (i32, i32) {
    %c0_i32 = arith.constant 0 : i32
    %c0_i32_0 = arith.constant 0 : i32
    %c0_i32_1 = arith.constant 0 : i32
    return %c0_i32, %c0_i32_0 : i32, i32
  }
  func.func @transform_6(%arg0: i32) -> (i32, i32) {
    %c0_i32 = arith.constant 0 : i32
    %c0_i32_0 = arith.constant 0 : i32
    %c0_i32_1 = arith.constant 0 : i32
    return %c0_i32, %c0_i32_0 : i32, i32
  }
  func.func @transform_7(%arg0: i32) -> (i32, i32) {
    %c0_i32 = arith.constant 0 : i32
    %c0_i32_0 = arith.constant 0 : i32
    return %arg0, %c0_i32 : i32, i32
  }
}

</mosaic_0001>

<bundles_post_ra>
// kernel: dnn_forward.1
= control target key start
LH: loop header
LB: loop body
LE: loop exit
PB: predicated region body
PF: predicated region fallthrough
CT: control target
= control target key end

     0   :  { %vm162_vm0 = vcmask 261120   ;;  %vm459_vm1 = vcmask 523264   ;;  %vm981_vm2 = vcmask 130048   ;;  %s1694_s1 = inlined_call_operand.vmem [shape: bf16[32,64], index: 1, kind: input, shape index: {}]   ;;  %s1695_s0 = inlined_call_operand.vmem [shape: bf16[256,32], index: 0, kind: input, shape index: {}]   ;;  %s1696_s3 = inlined_call_operand.vmem [shape: bf16[64,32], index: 3, kind: input, shape index: {}]   ;;  %s1697_s5 = inlined_call_operand.vmem [shape: bf16[32,16], index: 5, kind: input, shape index: {}]   ;;  %s1698_s2 = inlined_call_operand.vmem [shape: f32[1,64], index: 2, kind: input, shape index: {}]   ;;  %s1699_s4 = inlined_call_operand.vmem [shape: f32[1,32], index: 4, kind: input, shape index: {}]   ;;  %s1700_s6 = inlined_call_operand.vmem [shape: f32[1,16], index: 6, kind: input, shape index: {}]   ;;  %s1701_s7 = inlined_call_operand.vmem [shape: f32[256,16], index: 7, kind: output, shape index: {}]  }
   0x1   :  { %v1265_v0 = vld [vmem:[%s1694_s1] sm:$0xff]   ;;  %v1266_v1 = vld [vmem:[%s1694_s1 + $0x8] sm:$0xff]   ;;  %v1269_v4 = vld [vmem:[%s1695_s0 + $0x10] sm:$0xff]  }
   0x2   :  { %1149 = vmatprep.subr.bf16.mxu0 %v1265_v0  ;;  %v1267_v2 = vld [vmem:[%s1695_s0] sm:$0xff]   ;;  %1261 = vmatprep.subr.bf16.mxu1 %v1265_v0  ;;  %v1268_v3 = vld [vmem:[%s1695_s0 + $0x8] sm:$0xff]   ;;  %v1277_v7 = vld [vmem:[%s1695_s0 + $0x50] sm:$0xff]  }
   0x3   :  { %1150 = vmatpush3.bf16.msra.mxu0 %v1265_v0  ;;  %1263 = vmatpush3.bf16.msra.mxu1 %v1265_v0  ;;  %v1275_v5 = vld [vmem:[%s1695_s0 + $0x40] sm:$0xff]   ;;  %v1276_v6 = vld [vmem:[%s1695_s0 + $0x48] sm:$0xff]   ;;  %v1270_v8 = vld [vmem:[%s1695_s0 + $0x18] sm:$0xff]  }
   0x4   :  { %1151 = vmatprep.subr.bf16.mxu0 %v1266_v1  ;;  %1153 = vmatprep.mubr.msk.bf16.mxu0 %vm162_vm0, %v1267_v2  ;;  %v1271_v9 = vld [vmem:[%s1695_s0 + $0x20] sm:$0xff]   ;;  %v1278_v10 = vld [vmem:[%s1695_s0 + $0x58] sm:$0xff]   ;;  %v1284_v13 = vld [vmem:[%s1696_s3 + $0x8] sm:$0xff]  }
   0x5   :  { %1262 = vmatprep.subr.bf16.mxu1 %v1266_v1  ;;  %1169 = vmatprep.mubr.msk.bf16.mxu1 %vm162_vm0, %v1275_v5  ;;  %v1279_v11 = vld [vmem:[%s1695_s0 + $0x60] sm:$0xff]   ;;  %v1272_v14 = vld [vmem:[%s1695_s0 + $0x28] sm:$0xff]   ;;  %v1273_v15 = vld [vmem:[%s1695_s0 + $0x30] sm:$0xff]  }
   0x6   :  { %v1283_v12 = vld [vmem:[%s1696_s3] sm:$0xff]   ;;  %v1285_v16 = vld [vmem:[%s1696_s3 + $0x10] sm:$0xff]   ;;  %v1280_v17 = vld [vmem:[%s1695_s0 + $0x68] sm:$0xff]  }
   0x7   :  { %1152 = vmatpush3.bf16.msra.mxu0 %v1266_v1  ;;  %1264 = vmatpush3.bf16.msra.mxu1 %v1266_v1  ;;  %v1281_v18 = vld [vmem:[%s1695_s0 + $0x70] sm:$0xff]   ;;  %v1274_v19 = vld [vmem:[%s1695_s0 + $0x38] sm:$0xff]   ;;  %v1287_v22 = vld [vmem:[%s1697_s5] sm:$0xff]  }
   0x8   :  { %1185 = vmatprep.subr.bf16.mxu1 %v1283_v12  ;;  %v1282_v20 = vld [vmem:[%s1695_s0 + $0x78] sm:$0xff]   ;;  %v1288_v23 = vld [vmem:[%s1697_s5 + $0x8] sm:$0xff]   ;;  %1225 = vmatprep.subr.bf16.mxu0 %v1287_v22  ;;  %v1420_v24 = vld [vmem:[%s1698_s2] ss:$0 sm:$0xff] }
   0x9   :  { %v1286_v21 = vld [vmem:[%s1696_s3 + $0x18] sm:$0xff]  }
   0xa   :  { %1154 = vmatmul.mubr.msk.bf16.vlgmr.msra.gmra.mrb[0].mxu0 %vm162_vm0, %v1268_v3  ;;  %1170 = vmatmul.mubr.msk.bf16.vlgmr.msra.gmra.mrb[0].mxu1 %vm162_vm0, %v1276_v6 }
   0xb   :  { %1157 = vmatprep.mubr.msk.bf16.mxu0 %vm162_vm0, %v1269_v4  ;;  %1173 = vmatprep.mubr.msk.bf16.mxu1 %vm162_vm0, %v1277_v7 }
   0xc   :  { %1186 = vmatpush3.bf16.msra.mxu1 %v1283_v12  ;;  %1226 = vmatpush3.bf16.msra.mxu0 %v1287_v22 }
   0xd   :  { %1187 = vmatprep.subr.bf16.mxu1 %v1284_v13  ;;  %1227 = vmatprep.subr.bf16.mxu0 %v1288_v23 }
  0x10   :  { %1188 = vmatpush3.bf16.msra.mxu1 %v1284_v13  ;;  %1228 = vmatpush3.bf16.msra.mxu0 %v1288_v23 }
  0x11   :  { %1189 = vmatprep.subr.bf16.mxu1 %v1285_v16 }
  0x12   :  { %1158 = vmatmul.mubr.msk.bf16.gmra.mrb[4].mxu0 %vm162_vm0, %v1270_v8  ;;  %1174 = vmatmul.mubr.msk.bf16.gmra.mrb[4].mxu1 %vm162_vm0, %v1278_v10 }
  0x13   :  { %1161 = vmatprep.mubr.msk.bf16.mxu0 %vm162_vm0, %v1271_v9  ;;  %1177 = vmatprep.mubr.msk.bf16.mxu1 %vm162_vm0, %v1279_v11 }
  0x14   :  { %1190 = vmatpush3.bf16.msra.mxu1 %v1285_v16 }
  0x15   :  { %1191 = vmatprep.subr.bf16.mxu1 %v1286_v21 }
  0x18   :  { %1192 = vmatpush3.bf16.msra.mxu1 %v1286_v21 }
  0x1a   :  { %1162 = vmatmul.mubr.msk.bf16.gmra.mrb[8].mxu0 %vm162_vm0, %v1272_v14  ;;  %1178 = vmatmul.mubr.msk.bf16.gmra.mrb[8].mxu1 %vm162_vm0, %v1280_v17 }
  0x1b   :  { %1165 = vmatprep.mubr.msk.bf16.mxu0 %vm162_vm0, %v1273_v15  ;;  %1181 = vmatprep.mubr.msk.bf16.mxu1 %vm162_vm0, %v1281_v18 }
  0x22   :  { %1166 = vmatmul.mubr.msk.bf16.gmra.mrb[12].mxu0 %vm162_vm0, %v1274_v19  ;;  %1182 = vmatmul.mubr.msk.bf16.gmra.mrb[12].mxu1 %vm162_vm0, %v1282_v20 }
  0xdd   :  { %v1155_v25 = vpop.f32.mrb[0].mxu0  ;;  %v1171_v32 = vpop.f32.mrb[0].mxu1 }
  0xde   :  { %v254_v26 = vadd.f32 %v1155_v25, %v1420_v24  ;;  %v245_v27 = vpop.f32.mrb[1].mxu0  ;;  %v318_v34 = vadd.f32 %v1171_v32, %v1420_v24  ;;  %v309_v35 = vpop.f32.mrb[1].mxu1 }
  0xdf   :  { %v246_v28 = vadd.f32 %v1420_v24, %v245_v27  ;;  %v1156_v29 = vpop.f32.mrb[2].mxu0  ;;  %v310_v38 = vadd.f32 %v1420_v24, %v309_v35  ;;  %v1172_v39 = vpop.f32.mrb[2].mxu1 }
  0xe0   :  { %v257_v30 = vadd.f32 %v1156_v29, %v1420_v24  ;;  %v248_v31 = vpop.f32.mrb[3].mxu0  ;;  %v374_v36 = vmax.f32 %v254_v26, 0.0  ;;  %v390_v42 = vmax.f32 %v318_v34, 0.0  ;;  %v321_v43 = vadd.f32 %v1172_v39, %v1420_v24  ;;  %v312_v44 = vpop.f32.mrb[3].mxu1 }
  0xe1   :  { %v249_v33 = vadd.f32 %v1420_v24, %v248_v31  ;;  %v372_v40 = vmax.f32 %v246_v28, 0.0  ;;  %v388_v46 = vmax.f32 %v310_v38, 0.0  ;;  %v313_v47 = vadd.f32 %v1420_v24, %v312_v44 }
  0xe2   :  { %v375_v37 = vmax.f32 %v257_v30, 0.0  ;;  %v391_v50 = vmax.f32 %v321_v43, 0.0 }
  0xe3   :  { %v373_v41 = vmax.f32 %v249_v33, 0.0  ;;  %v389_v53 = vmax.f32 %v313_v47, 0.0 }
  0xe4   :  { %v405_v45 = vpack.c.bf16 %v375_v37, %v374_v36  ;;  %v1433_v56 = vpack.c.bf16 %v391_v50, %v390_v42 }
  0xe5   :  { %v404_v48 = vpack.c.bf16 %v373_v41, %v372_v40  ;;  %v1159_v49 = vpop.f32.mrb[4].mxu0  ;;  %v1437_v59 = vpack.c.bf16 %v389_v53, %v388_v46  ;;  %v1175_v60 = vpop.f32.mrb[4].mxu1 }
  0xe6   :  { %v270_v51 = vadd.f32 %v1159_v49, %v1420_v24  ;;  %v261_v52 = vpop.f32.mrb[5].mxu0  ;;  %v334_v62 = vadd.f32 %v1175_v60, %v1420_v24  ;;  %v325_v63 = vpop.f32.mrb[5].mxu1 }
  0xe7   :  { %v262_v54 = vadd.f32 %v1420_v24, %v261_v52  ;;  %v1160_v55 = vpop.f32.mrb[6].mxu0  ;;  %1193 = vmatprep.mubr.msk.bf16.mxu1 %vm459_vm1, %v404_v48  ;;  %v326_v2 = vadd.f32 %v1420_v24, %v325_v63  ;;  %v1176_v3 = vpop.f32.mrb[6].mxu1 }
  0xe8   :  { %v273_v57 = vadd.f32 %v1160_v55, %v1420_v24  ;;  %v264_v58 = vpop.f32.mrb[7].mxu0  ;;  %1194 = vmatmul.mubr.msk.bf16.vlgmr.msra.gmra.mrb[16].mxu1 %vm459_vm1, %v405_v45  ;;  %v378_v0 = vmax.f32 %v270_v51, 0.0  ;;  %v394_v6 = vmax.f32 %v334_v62, 0.0  ;;  %v337_v7 = vadd.f32 %v1176_v3, %v1420_v24  ;;  %v328_v8 = vpop.f32.mrb[7].mxu1 }
  0xe9   :  { %v265_v61 = vadd.f32 %v1420_v24, %v264_v58  ;;  %v376_v4 = vmax.f32 %v262_v54, 0.0  ;;  %v392_v10 = vmax.f32 %v326_v2, 0.0  ;;  %v329_v11 = vadd.f32 %v1420_v24, %v328_v8 }
  0xea   :  { %v379_v1 = vmax.f32 %v273_v57, 0.0  ;;  %v395_v14 = vmax.f32 %v337_v7, 0.0 }
  0xeb   :  { %v377_v5 = vmax.f32 %v265_v61, 0.0  ;;  %v393_v17 = vmax.f32 %v329_v11, 0.0 }
  0xec   :  { %v407_v9 = vpack.c.bf16 %v379_v1, %v378_v0  ;;  %v415_v20 = vpack.c.bf16 %v395_v14, %v394_v6 }
  0xed   :  { %v406_v12 = vpack.c.bf16 %v377_v5, %v376_v4  ;;  %v1163_v13 = vpop.f32.mrb[8].mxu0  ;;  %v414_v23 = vpack.c.bf16 %v393_v17, %v392_v10  ;;  %v1179_v25 = vpop.f32.mrb[8].mxu1 }
  0xee   :  { %v286_v15 = vadd.f32 %v1163_v13, %v1420_v24  ;;  %v277_v16 = vpop.f32.mrb[9].mxu0  ;;  %v350_v27 = vadd.f32 %v1179_v25, %v1420_v24  ;;  %v341_v28 = vpop.f32.mrb[9].mxu1 }
  0xef   :  { %v278_v18 = vadd.f32 %v1420_v24, %v277_v16  ;;  %v1164_v19 = vpop.f32.mrb[10].mxu0  ;;  %1197 = vmatprep.mubr.msk.bf16.mxu1 %vm459_vm1, %v406_v12  ;;  %v342_v31 = vadd.f32 %v1420_v24, %v341_v28  ;;  %v1180_v32 = vpop.f32.mrb[10].mxu1 }
  0xf0   :  { %v289_v21 = vadd.f32 %v1164_v19, %v1420_v24  ;;  %v280_v22 = vpop.f32.mrb[11].mxu0  ;;  %1198 = vmatmul.mubr.msk.bf16.gmra.mrb[20].mxu1 %vm459_vm1, %v407_v9  ;;  %v382_v29 = vmax.f32 %v286_v15, 0.0  ;;  %v398_v35 = vmax.f32 %v350_v27, 0.0  ;;  %v353_v36 = vadd.f32 %v1180_v32, %v1420_v24  ;;  %v344_v37 = vpop.f32.mrb[11].mxu1 }
  0xf1   :  { %v281_v26 = vadd.f32 %v1420_v24, %v280_v22  ;;  %v380_v33 = vmax.f32 %v278_v18, 0.0  ;;  %v396_v39 = vmax.f32 %v342_v31, 0.0  ;;  %v345_v40 = vadd.f32 %v1420_v24, %v344_v37 }
  0xf2   :  { %v383_v30 = vmax.f32 %v289_v21, 0.0  ;;  %v399_v43 = vmax.f32 %v353_v36, 0.0 }
  0xf3   :  { %v381_v34 = vmax.f32 %v281_v26, 0.0  ;;  %v397_v46 = vmax.f32 %v345_v40, 0.0 }
  0xf4   :  { %v409_v38 = vpack.c.bf16 %v383_v30, %v382_v29  ;;  %v417_v49 = vpack.c.bf16 %v399_v43, %v398_v35 }
  0xf5   :  { %v408_v41 = vpack.c.bf16 %v381_v34, %v380_v33  ;;  %v1167_v42 = vpop.f32.mrb[12].mxu0  ;;  %v416_v52 = vpack.c.bf16 %v397_v46, %v396_v39  ;;  %v1183_v53 = vpop.f32.mrb[12].mxu1 }
  0xf6   :  { %v302_v44 = vadd.f32 %v1167_v42, %v1420_v24  ;;  %v293_v45 = vpop.f32.mrb[13].mxu0  ;;  %v366_v55 = vadd.f32 %v1183_v53, %v1420_v24  ;;  %v357_v57 = vpop.f32.mrb[13].mxu1 }
  0xf7   :  { %v294_v47 = vadd.f32 %v1420_v24, %v293_v45  ;;  %v1168_v48 = vpop.f32.mrb[14].mxu0  ;;  %1201 = vmatprep.mubr.msk.bf16.mxu1 %vm459_vm1, %v408_v41  ;;  %v358_v61 = vadd.f32 %v1420_v24, %v357_v57  ;;  %v1184_v62 = vpop.f32.mrb[14].mxu1 }
  0xf8   :  { %v305_v50 = vadd.f32 %v1168_v48, %v1420_v24  ;;  %v296_v51 = vpop.f32.mrb[15].mxu0  ;;  %1202 = vmatmul.mubr.msk.bf16.gmra.mrb[24].mxu1 %vm459_vm1, %v409_v38  ;;  %v386_v58 = vmax.f32 %v302_v44, 0.0  ;;  %v402_v1 = vmax.f32 %v366_v55, 0.0  ;;  %v369_v2 = vadd.f32 %v1184_v62, %v1420_v24  ;;  %v360_v3 = vpop.f32.mrb[15].mxu1 }
  0xf9   :  { %v297_v54 = vadd.f32 %v1420_v24, %v296_v51  ;;  %v384_v63 = vmax.f32 %v294_v47, 0.0  ;;  %v400_v5 = vmax.f32 %v358_v61, 0.0  ;;  %v361_v6 = vadd.f32 %v1420_v24, %v360_v3  ;;  %v1479_v24 = vld [vmem:[%s1699_s4] ss:$0 sm:$0xff] }
  0xfa   :  { %v387_v60 = vmax.f32 %v305_v50, 0.0  ;;  %v403_v8 = vmax.f32 %v369_v2, 0.0 }
  0xfb   :  { %v385_v0 = vmax.f32 %v297_v54, 0.0  ;;  %v401_v9 = vmax.f32 %v361_v6, 0.0 }
  0xfc   :  { %v411_v4 = vpack.c.bf16 %v387_v60, %v386_v58  ;;  %v419_v10 = vpack.c.bf16 %v403_v8, %v402_v1 }
  0xfd   :  { %v410_v7 = vpack.c.bf16 %v385_v0, %v384_v63  ;;  %v418_v11 = vpack.c.bf16 %v401_v9, %v400_v5 }
  0xff   :  { %1205 = vmatprep.mubr.msk.bf16.mxu1 %vm459_vm1, %v410_v7 }
 0x100   :  { %1206 = vmatmul.mubr.msk.bf16.gmra.mrb[28].mxu1 %vm459_vm1, %v411_v4 }
 0x101   :  { %1209 = vmatprep.mubr.msk.bf16.mxu1 %vm459_vm1, %v1437_v59 }
 0x108   :  { %1210 = vmatmul.mubr.msk.bf16.gmra.mrb[32].mxu1 %vm459_vm1, %v1433_v56 }
 0x109   :  { %1213 = vmatprep.mubr.msk.bf16.mxu1 %vm459_vm1, %v414_v23 }
 0x110   :  { %1214 = vmatmul.mubr.msk.bf16.gmra.mrb[36].mxu1 %vm459_vm1, %v415_v20 }
 0x111   :  { %1217 = vmatprep.mubr.msk.bf16.mxu1 %vm459_vm1, %v416_v52 }
 0x118   :  { %1218 = vmatmul.mubr.msk.bf16.gmra.mrb[40].mxu1 %vm459_vm1, %v417_v49 }
 0x119   :  { %1221 = vmatprep.mubr.msk.bf16.mxu1 %vm459_vm1, %v418_v11 }
 0x120   :  { %1222 = vmatmul.mubr.msk.bf16.gmra.mrb[44].mxu1 %vm459_vm1, %v419_v10 }
 0x1bb   :  { %v1195_v59 = vpop.f32.mrb[16].mxu1 }
 0x1bc   :  { %v551_v56 = vadd.f32 %v1195_v59, %v1479_v24  ;;  %v542_v12 = vpop.f32.mrb[17].mxu1 }
 0x1bd   :  { %v543_v13 = vadd.f32 %v1479_v24, %v542_v12  ;;  %v1196_v14 = vpop.f32.mrb[18].mxu1 }
 0x1be   :  { %v554_v15 = vadd.f32 %v1196_v14, %v1479_v24  ;;  %v545_v16 = vpop.f32.mrb[19].mxu1  ;;  %v671_v18 = vmax.f32 %v551_v56, 0.0 }
 0x1bf   :  { %v546_v17 = vadd.f32 %v1479_v24, %v545_v16  ;;  %v669_v20 = vmax.f32 %v543_v13, 0.0 }
 0x1c0   :  { %v672_v19 = vmax.f32 %v554_v15, 0.0 }
 0x1c1   :  { %v670_v21 = vmax.f32 %v546_v17, 0.0 }
 0x1c2   :  { %v702_v22 = vpack.c.bf16 %v672_v19, %v671_v18 }
 0x1c3   :  { %v701_v23 = vpack.c.bf16 %v670_v21, %v669_v20  ;;  %v1199_v25 = vpop.f32.mrb[20].mxu1 }
 0x1c4   :  { %v567_v26 = vadd.f32 %v1199_v25, %v1479_v24  ;;  %v558_v27 = vpop.f32.mrb[21].mxu1 }
 0x1c5   :  { %v559_v28 = vadd.f32 %v1479_v24, %v558_v27  ;;  %v1200_v29 = vpop.f32.mrb[22].mxu1  ;;  %1229 = vmatprep.mubr.msk.bf16.mxu0 %vm162_vm0, %v701_v23 }
 0x1c6   :  { %v570_v30 = vadd.f32 %v1200_v29, %v1479_v24  ;;  %v561_v31 = vpop.f32.mrb[23].mxu1  ;;  %1230 = vmatmul.mubr.msk.bf16.vlgmr.msra.gmra.mrb[16].mxu0 %vm162_vm0, %v702_v22  ;;  %v675_v33 = vmax.f32 %v567_v26, 0.0 }
 0x1c7   :  { %v562_v32 = vadd.f32 %v1479_v24, %v561_v31  ;;  %v673_v35 = vmax.f32 %v559_v28, 0.0 }
 0x1c8   :  { %v676_v34 = vmax.f32 %v570_v30, 0.0 }
 0x1c9   :  { %v674_v36 = vmax.f32 %v562_v32, 0.0 }
 0x1ca   :  { %v704_v37 = vpack.c.bf16 %v676_v34, %v675_v33 }
 0x1cb   :  { %v703_v38 = vpack.c.bf16 %v674_v36, %v673_v35  ;;  %v1203_v39 = vpop.f32.mrb[24].mxu1 }
 0x1cc   :  { %v583_v40 = vadd.f32 %v1203_v39, %v1479_v24  ;;  %v574_v41 = vpop.f32.mrb[25].mxu1 }
 0x1cd   :  { %v575_v42 = vadd.f32 %v1479_v24, %v574_v41  ;;  %v1204_v43 = vpop.f32.mrb[26].mxu1  ;;  %1233 = vmatprep.mubr.msk.bf16.mxu0 %vm162_vm0, %v703_v38 }
 0x1ce   :  { %v586_v44 = vadd.f32 %v1204_v43, %v1479_v24  ;;  %v577_v45 = vpop.f32.mrb[27].mxu1  ;;  %1234 = vmatmul.mubr.msk.bf16.gmra.mrb[20].mxu0 %vm162_vm0, %v704_v37  ;;  %v679_v47 = vmax.f32 %v583_v40, 0.0 }
 0x1cf   :  { %v578_v46 = vadd.f32 %v1479_v24, %v577_v45  ;;  %v677_v49 = vmax.f32 %v575_v42, 0.0 }
 0x1d0   :  { %v680_v48 = vmax.f32 %v586_v44, 0.0 }
 0x1d1   :  { %v678_v50 = vmax.f32 %v578_v46, 0.0 }
 0x1d2   :  { %v706_v51 = vpack.c.bf16 %v680_v48, %v679_v47 }
 0x1d3   :  { %v705_v52 = vpack.c.bf16 %v678_v50, %v677_v49  ;;  %v1207_v53 = vpop.f32.mrb[28].mxu1 }
 0x1d4   :  { %v599_v54 = vadd.f32 %v1207_v53, %v1479_v24  ;;  %v590_v55 = vpop.f32.mrb[29].mxu1 }
 0x1d5   :  { %v591_v57 = vadd.f32 %v1479_v24, %v590_v55  ;;  %v1208_v58 = vpop.f32.mrb[30].mxu1  ;;  %1237 = vmatprep.mubr.msk.bf16.mxu0 %vm162_vm0, %v705_v52 }
 0x1d6   :  { %v602_v60 = vadd.f32 %v1208_v58, %v1479_v24  ;;  %v593_v61 = vpop.f32.mrb[31].mxu1  ;;  %1238 = vmatmul.mubr.msk.bf16.gmra.mrb[24].mxu0 %vm162_vm0, %v706_v51  ;;  %v683_v63 = vmax.f32 %v599_v54, 0.0 }
 0x1d7   :  { %v594_v62 = vadd.f32 %v1479_v24, %v593_v61  ;;  %v681_v1 = vmax.f32 %v591_v57, 0.0 }
 0x1d8   :  { %v684_v0 = vmax.f32 %v602_v60, 0.0 }
 0x1d9   :  { %v682_v2 = vmax.f32 %v594_v62, 0.0  ;;  %v1532_v62 = vld [vmem:[%s1700_s6] ss:$0 sm:$0xff] }
 0x1da   :  { %v708_v3 = vpack.c.bf16 %v684_v0, %v683_v63 }
 0x1db   :  { %v707_v4 = vpack.c.bf16 %v682_v2, %v681_v1  ;;  %v1211_v5 = vpop.f32.mrb[32].mxu1 }
 0x1dc   :  { %v615_v6 = vadd.f32 %v1211_v5, %v1479_v24  ;;  %v606_v7 = vpop.f32.mrb[33].mxu1 }
 0x1dd   :  { %v607_v8 = vadd.f32 %v1479_v24, %v606_v7  ;;  %v1212_v9 = vpop.f32.mrb[34].mxu1  ;;  %1241 = vmatprep.mubr.msk.bf16.mxu0 %vm162_vm0, %v707_v4 }
 0x1de   :  { %v618_v10 = vadd.f32 %v1212_v9, %v1479_v24  ;;  %v609_v11 = vpop.f32.mrb[35].mxu1  ;;  %1242 = vmatmul.mubr.msk.bf16.gmra.mrb[28].mxu0 %vm162_vm0, %v708_v3  ;;  %v687_v56 = vmax.f32 %v615_v6, 0.0 }
 0x1df   :  { %v610_v59 = vadd.f32 %v1479_v24, %v609_v11  ;;  %v685_v13 = vmax.f32 %v607_v8, 0.0 }
 0x1e0   :  { %v688_v12 = vmax.f32 %v618_v10, 0.0 }
 0x1e1   :  { %v686_v14 = vmax.f32 %v610_v59, 0.0 }
 0x1e2   :  { %v710_v15 = vpack.c.bf16 %v688_v12, %v687_v56 }
 0x1e3   :  { %v709_v16 = vpack.c.bf16 %v686_v14, %v685_v13  ;;  %v1215_v17 = vpop.f32.mrb[36].mxu1 }
 0x1e4   :  { %v631_v18 = vadd.f32 %v1215_v17, %v1479_v24  ;;  %v622_v19 = vpop.f32.mrb[37].mxu1 }
 0x1e5   :  { %v623_v20 = vadd.f32 %v1479_v24, %v622_v19  ;;  %v1216_v21 = vpop.f32.mrb[38].mxu1  ;;  %1245 = vmatprep.mubr.msk.bf16.mxu0 %vm162_vm0, %v709_v16 }
 0x1e6   :  { %v634_v22 = vadd.f32 %v1216_v21, %v1479_v24  ;;  %v625_v23 = vpop.f32.mrb[39].mxu1  ;;  %1246 = vmatmul.mubr.msk.bf16.gmra.mrb[32].mxu0 %vm162_vm0, %v710_v15  ;;  %v691_v26 = vmax.f32 %v631_v18, 0.0 }
 0x1e7   :  { %v626_v25 = vadd.f32 %v1479_v24, %v625_v23  ;;  %v689_v28 = vmax.f32 %v623_v20, 0.0 }
 0x1e8   :  { %v692_v27 = vmax.f32 %v634_v22, 0.0 }
 0x1e9   :  { %v690_v29 = vmax.f32 %v626_v25, 0.0 }
 0x1ea   :  { %v712_v30 = vpack.c.bf16 %v692_v27, %v691_v26 }
 0x1eb   :  { %v711_v31 = vpack.c.bf16 %v690_v29, %v689_v28  ;;  %v1219_v32 = vpop.f32.mrb[40].mxu1 }
 0x1ec   :  { %v647_v33 = vadd.f32 %v1219_v32, %v1479_v24  ;;  %v638_v34 = vpop.f32.mrb[41].mxu1 }
 0x1ed   :  { %v639_v35 = vadd.f32 %v1479_v24, %v638_v34  ;;  %v1220_v36 = vpop.f32.mrb[42].mxu1  ;;  %1249 = vmatprep.mubr.msk.bf16.mxu0 %vm162_vm0, %v711_v31 }
 0x1ee   :  { %v650_v37 = vadd.f32 %v1220_v36, %v1479_v24  ;;  %v641_v38 = vpop.f32.mrb[43].mxu1  ;;  %1250 = vmatmul.mubr.msk.bf16.gmra.mrb[36].mxu0 %vm162_vm0, %v712_v30  ;;  %v695_v40 = vmax.f32 %v647_v33, 0.0 }
 0x1ef   :  { %v642_v39 = vadd.f32 %v1479_v24, %v641_v38  ;;  %v693_v42 = vmax.f32 %v639_v35, 0.0 }
 0x1f0   :  { %v696_v41 = vmax.f32 %v650_v37, 0.0 }
 0x1f1   :  { %v694_v43 = vmax.f32 %v642_v39, 0.0 }
 0x1f2   :  { %v714_v44 = vpack.c.bf16 %v696_v41, %v695_v40 }
 0x1f3   :  { %v713_v45 = vpack.c.bf16 %v694_v43, %v693_v42  ;;  %v1223_v46 = vpop.f32.mrb[44].mxu1 }
 0x1f4   :  { %v663_v47 = vadd.f32 %v1223_v46, %v1479_v24  ;;  %v654_v48 = vpop.f32.mrb[45].mxu1 }
 0x1f5   :  { %v655_v49 = vadd.f32 %v1479_v24, %v654_v48  ;;  %v1224_v50 = vpop.f32.mrb[46].mxu1  ;;  %1253 = vmatprep.mubr.msk.bf16.mxu0 %vm162_vm0, %v713_v45 }
 0x1f6   :  { %v666_v51 = vadd.f32 %v1224_v50, %v1479_v24  ;;  %v657_v52 = vpop.f32.mrb[47].mxu1  ;;  %1254 = vmatmul.mubr.msk.bf16.gmra.mrb[40].mxu0 %vm162_vm0, %v714_v44  ;;  %v699_v54 = vmax.f32 %v663_v47, 0.0 }
 0x1f7   :  { %v658_v53 = vadd.f32 %v1479_v24, %v657_v52  ;;  %v697_v57 = vmax.f32 %v655_v49, 0.0 }
 0x1f8   :  { %v700_v55 = vmax.f32 %v666_v51, 0.0 }
 0x1f9   :  { %v698_v58 = vmax.f32 %v658_v53, 0.0 }
 0x1fa   :  { %v716_v60 = vpack.c.bf16 %v700_v55, %v699_v54 }
 0x1fb   :  { %v715_v61 = vpack.c.bf16 %v698_v58, %v697_v57 }
 0x1fd   :  { %1257 = vmatprep.mubr.msk.bf16.mxu0 %vm162_vm0, %v715_v61 }
 0x1fe   :  { %1258 = vmatmul.mubr.msk.bf16.gmra.mrb[44].mxu0 %vm162_vm0, %v716_v60 }
 0x299   :  { %v1231_v63 = vpop.f32.mrb[16].mxu0 }
 0x29a   :  { %v831_v0 = vadd.f32 %v1231_v63, %v1532_v62  ;;  %v822_v1 = vpop.f32.mrb[17].mxu0 }
 0x29b   :  { %v823_v24 = vadd.f32 %v1532_v62, %v822_v1  ;;  %v1232_v2 = vpop.f32.mrb[18].mxu0 }
 0x29c   :  { %v951_v3 = vmax.f32 %v831_v0, 0.0  ;;  %v834_v4 = vadd.f32 %v1232_v2, %v1532_v62  ;;  %v825_v5 = vpop.f32.mrb[19].mxu0 }
 0x29d   :  { %v949_v6 = vmax.f32 %v823_v24, 0.0  ;;  %v826_v7 = vadd.f32 %v1532_v62, %v825_v5 }
 0x29e   :  { %984 = vst.msk [vmem:[%s1701_s7 + $0x10] sm:$0xff] %vm981_vm2, %v951_v3  ;;  %v952_v8 = vmax.f32 %v834_v4, 0.0 }
 0x29f   :  { %982 = vst.msk [vmem:[%s1701_s7] sm:$0xff] %vm981_vm2, %v949_v6  ;;  %v950_v9 = vmax.f32 %v826_v7, 0.0 }
 0x2a0   :  { %985 = vst.msk [vmem:[%s1701_s7 + $0x18] sm:$0xff] %vm981_vm2, %v952_v8 }
 0x2a1   :  { %983 = vst.msk [vmem:[%s1701_s7 + $0x8] sm:$0xff] %vm981_vm2, %v950_v9  ;;  %v1235_v10 = vpop.f32.mrb[20].mxu0 }
 0x2a2   :  { %v847_v11 = vadd.f32 %v1235_v10, %v1532_v62  ;;  %v838_v59 = vpop.f32.mrb[21].mxu0 }
 0x2a3   :  { %v839_v56 = vadd.f32 %v1532_v62, %v838_v59  ;;  %v1236_v12 = vpop.f32.mrb[22].mxu0 }
 0x2a4   :  { %v955_v13 = vmax.f32 %v847_v11, 0.0  ;;  %v850_v14 = vadd.f32 %v1236_v12, %v1532_v62  ;;  %v841_v15 = vpop.f32.mrb[23].mxu0 }
 0x2a5   :  { %v953_v16 = vmax.f32 %v839_v56, 0.0  ;;  %v842_v17 = vadd.f32 %v1532_v62, %v841_v15 }
 0x2a6   :  { %988 = vst.msk [vmem:[%s1701_s7 + $0x30] sm:$0xff] %vm981_vm2, %v955_v13  ;;  %v956_v18 = vmax.f32 %v850_v14, 0.0 }
 0x2a7   :  { %986 = vst.msk [vmem:[%s1701_s7 + $0x20] sm:$0xff] %vm981_vm2, %v953_v16  ;;  %v954_v19 = vmax.f32 %v842_v17, 0.0 }
 0x2a8   :  { %989 = vst.msk [vmem:[%s1701_s7 + $0x38] sm:$0xff] %vm981_vm2, %v956_v18 }
 0x2a9   :  { %987 = vst.msk [vmem:[%s1701_s7 + $0x28] sm:$0xff] %vm981_vm2, %v954_v19  ;;  %v1239_v20 = vpop.f32.mrb[24].mxu0 }
 0x2aa   :  { %v863_v21 = vadd.f32 %v1239_v20, %v1532_v62  ;;  %v854_v22 = vpop.f32.mrb[25].mxu0 }
 0x2ab   :  { %v855_v23 = vadd.f32 %v1532_v62, %v854_v22  ;;  %v1240_v25 = vpop.f32.mrb[26].mxu0 }
 0x2ac   :  { %v959_v26 = vmax.f32 %v863_v21, 0.0  ;;  %v866_v27 = vadd.f32 %v1240_v25, %v1532_v62  ;;  %v857_v28 = vpop.f32.mrb[27].mxu0 }
 0x2ad   :  { %v957_v29 = vmax.f32 %v855_v23, 0.0  ;;  %v858_v30 = vadd.f32 %v1532_v62, %v857_v28 }
 0x2ae   :  { %992 = vst.msk [vmem:[%s1701_s7 + $0x50] sm:$0xff] %vm981_vm2, %v959_v26  ;;  %v960_v31 = vmax.f32 %v866_v27, 0.0 }
 0x2af   :  { %990 = vst.msk [vmem:[%s1701_s7 + $0x40] sm:$0xff] %vm981_vm2, %v957_v29  ;;  %v958_v32 = vmax.f32 %v858_v30, 0.0 }
 0x2b0   :  { %993 = vst.msk [vmem:[%s1701_s7 + $0x58] sm:$0xff] %vm981_vm2, %v960_v31 }
 0x2b1   :  { %991 = vst.msk [vmem:[%s1701_s7 + $0x48] sm:$0xff] %vm981_vm2, %v958_v32  ;;  %v1243_v33 = vpop.f32.mrb[28].mxu0 }
 0x2b2   :  { %v879_v34 = vadd.f32 %v1243_v33, %v1532_v62  ;;  %v870_v35 = vpop.f32.mrb[29].mxu0 }
 0x2b3   :  { %v871_v36 = vadd.f32 %v1532_v62, %v870_v35  ;;  %v1244_v37 = vpop.f32.mrb[30].mxu0 }
 0x2b4   :  { %v963_v38 = vmax.f32 %v879_v34, 0.0  ;;  %v882_v39 = vadd.f32 %v1244_v37, %v1532_v62  ;;  %v873_v40 = vpop.f32.mrb[31].mxu0 }
 0x2b5   :  { %v961_v41 = vmax.f32 %v871_v36, 0.0  ;;  %v874_v42 = vadd.f32 %v1532_v62, %v873_v40 }
 0x2b6   :  { %996 = vst.msk [vmem:[%s1701_s7 + $0x70] sm:$0xff] %vm981_vm2, %v963_v38  ;;  %v964_v43 = vmax.f32 %v882_v39, 0.0 }
 0x2b7   :  { %994 = vst.msk [vmem:[%s1701_s7 + $0x60] sm:$0xff] %vm981_vm2, %v961_v41  ;;  %v962_v44 = vmax.f32 %v874_v42, 0.0 }
 0x2b8   :  { %997 = vst.msk [vmem:[%s1701_s7 + $0x78] sm:$0xff] %vm981_vm2, %v964_v43 }
 0x2b9   :  { %995 = vst.msk [vmem:[%s1701_s7 + $0x68] sm:$0xff] %vm981_vm2, %v962_v44  ;;  %v1247_v45 = vpop.f32.mrb[32].mxu0 }
 0x2ba   :  { %v895_v46 = vadd.f32 %v1247_v45, %v1532_v62  ;;  %v886_v47 = vpop.f32.mrb[33].mxu0 }
 0x2bb   :  { %v887_v48 = vadd.f32 %v1532_v62, %v886_v47  ;;  %v1248_v49 = vpop.f32.mrb[34].mxu0 }
 0x2bc   :  { %v967_v50 = vmax.f32 %v895_v46, 0.0  ;;  %v898_v51 = vadd.f32 %v1248_v49, %v1532_v62  ;;  %v889_v52 = vpop.f32.mrb[35].mxu0 }
 0x2bd   :  { %v965_v53 = vmax.f32 %v887_v48, 0.0  ;;  %v890_v54 = vadd.f32 %v1532_v62, %v889_v52 }
 0x2be   :  { %1000 = vst.msk [vmem:[%s1701_s7 + $0x90] sm:$0xff] %vm981_vm2, %v967_v50  ;;  %v968_v55 = vmax.f32 %v898_v51, 0.0 }
 0x2bf   :  { %998 = vst.msk [vmem:[%s1701_s7 + $0x80] sm:$0xff] %vm981_vm2, %v965_v53  ;;  %v966_v57 = vmax.f32 %v890_v54, 0.0 }
 0x2c0   :  { %1001 = vst.msk [vmem:[%s1701_s7 + $0x98] sm:$0xff] %vm981_vm2, %v968_v55 }
 0x2c1   :  { %999 = vst.msk [vmem:[%s1701_s7 + $0x88] sm:$0xff] %vm981_vm2, %v966_v57  ;;  %v1251_v58 = vpop.f32.mrb[36].mxu0 }
 0x2c2   :  { %v911_v60 = vadd.f32 %v1251_v58, %v1532_v62  ;;  %v902_v61 = vpop.f32.mrb[37].mxu0 }
 0x2c3   :  { %v903_v63 = vadd.f32 %v1532_v62, %v902_v61  ;;  %v1252_v0 = vpop.f32.mrb[38].mxu0 }
 0x2c4   :  { %v971_v1 = vmax.f32 %v911_v60, 0.0  ;;  %v914_v24 = vadd.f32 %v1252_v0, %v1532_v62  ;;  %v905_v2 = vpop.f32.mrb[39].mxu0 }
 0x2c5   :  { %v969_v3 = vmax.f32 %v903_v63, 0.0  ;;  %v906_v4 = vadd.f32 %v1532_v62, %v905_v2 }
 0x2c6   :  { %1004 = vst.msk [vmem:[%s1701_s7 + $0xb0] sm:$0xff] %vm981_vm2, %v971_v1  ;;  %v972_v5 = vmax.f32 %v914_v24, 0.0 }
 0x2c7   :  { %1002 = vst.msk [vmem:[%s1701_s7 + $0xa0] sm:$0xff] %vm981_vm2, %v969_v3  ;;  %v970_v6 = vmax.f32 %v906_v4, 0.0 }
 0x2c8   :  { %1005 = vst.msk [vmem:[%s1701_s7 + $0xb8] sm:$0xff] %vm981_vm2, %v972_v5 }
 0x2c9   :  { %1003 = vst.msk [vmem:[%s1701_s7 + $0xa8] sm:$0xff] %vm981_vm2, %v970_v6  ;;  %v1255_v7 = vpop.f32.mrb[40].mxu0 }
 0x2ca   :  { %v927_v8 = vadd.f32 %v1255_v7, %v1532_v62  ;;  %v918_v9 = vpop.f32.mrb[41].mxu0 }
 0x2cb   :  { %v919_v10 = vadd.f32 %v1532_v62, %v918_v9  ;;  %v1256_v11 = vpop.f32.mrb[42].mxu0 }
 0x2cc   :  { %v975_v59 = vmax.f32 %v927_v8, 0.0  ;;  %v930_v56 = vadd.f32 %v1256_v11, %v1532_v62  ;;  %v921_v12 = vpop.f32.mrb[43].mxu0 }
 0x2cd   :  { %v973_v13 = vmax.f32 %v919_v10, 0.0  ;;  %v922_v14 = vadd.f32 %v1532_v62, %v921_v12 }
 0x2ce   :  { %1008 = vst.msk [vmem:[%s1701_s7 + $0xd0] sm:$0xff] %vm981_vm2, %v975_v59  ;;  %v976_v15 = vmax.f32 %v930_v56, 0.0 }
 0x2cf   :  { %1006 = vst.msk [vmem:[%s1701_s7 + $0xc0] sm:$0xff] %vm981_vm2, %v973_v13  ;;  %v974_v16 = vmax.f32 %v922_v14, 0.0 }
 0x2d0   :  { %1009 = vst.msk [vmem:[%s1701_s7 + $0xd8] sm:$0xff] %vm981_vm2, %v976_v15 }
 0x2d1   :  { %1007 = vst.msk [vmem:[%s1701_s7 + $0xc8] sm:$0xff] %vm981_vm2, %v974_v16  ;;  %v1259_v17 = vpop.f32.mrb[44].mxu0 }
 0x2d2   :  { %v943_v18 = vadd.f32 %v1259_v17, %v1532_v62  ;;  %v934_v19 = vpop.f32.mrb[45].mxu0 }
 0x2d3   :  { %v935_v20 = vadd.f32 %v1532_v62, %v934_v19  ;;  %v1260_v21 = vpop.f32.mrb[46].mxu0 }
 0x2d4   :  { %v979_v22 = vmax.f32 %v943_v18, 0.0  ;;  %v946_v23 = vadd.f32 %v1260_v21, %v1532_v62  ;;  %v937_v25 = vpop.f32.mrb[47].mxu0 }
 0x2d5   :  { %v977_v26 = vmax.f32 %v935_v20, 0.0  ;;  %v938_v27 = vadd.f32 %v1532_v62, %v937_v25 }
 0x2d6   :  { %1012 = vst.msk [vmem:[%s1701_s7 + $0xf0] sm:$0xff] %vm981_vm2, %v979_v22  ;;  %v980_v28 = vmax.f32 %v946_v23, 0.0 }
 0x2d7   :  { %1010 = vst.msk [vmem:[%s1701_s7 + $0xe0] sm:$0xff] %vm981_vm2, %v977_v26  ;;  %v978_v29 = vmax.f32 %v938_v27, 0.0 }
 0x2d8   :  { %1013 = vst.msk [vmem:[%s1701_s7 + $0xf8] sm:$0xff] %vm981_vm2, %v980_v28 }
 0x2d9   :  { %1011 = vst.msk [vmem:[%s1701_s7 + $0xe8] sm:$0xff] %vm981_vm2, %v978_v29 }

</bundles_post_ra>
